<compile_context>
chip_gen: v7x
topology: tpu7x:2x2x1
jax: 0.10.0
libtpu: 0.0.40
codegen_flags: <defaults>
</compile_context>

<pallas_src>
import functools

import jax
import jax.numpy as jnp
from jax.experimental import pallas as pl
from jax.experimental.pallas import tpu as pltpu


def _round_up(x, m):
    return (x + m - 1) // m * m


def _vmem_budget_bytes():
    """Generation-aware scoped-VMEM budget (headroom left for Mosaic scratch)."""
    cap = 64 * 1024 * 1024                    # conservative default (v7x per-TC)
    try:
        cap = int(pltpu.get_tpu_info().vmem_capacity_bytes)
    except Exception:
        pass
    return min(int(cap * 0.8), 100 * 1024 * 1024)


def _select_row_tile(M, per_row_bytes, budget_bytes):
    """Largest power-of-two row tile (>=8) that fits the VMEM budget, keeps
    padded-row waste <= 12.5%, and leaves >= 2 row tiles when M allows."""
    m8 = _round_up(M, 8)
    tm = 8
    for cand in (1024, 512, 256, 128, 64, 32, 16, 8):
        if cand > m8 or cand * per_row_bytes > budget_bytes:
            continue
        mp = _round_up(M, cand)
        if 8 * (mp - M) <= mp:                # <= 12.5% padded rows
            tm = cand
            break
    # >= 2 row tiles so the "parallel" row axis can shard across v7x's 2 TCs.
    while tm > 8 and _round_up(M, tm) // tm < 2:
        tm //= 2
    return tm


def _select_hidden_tile(H, Dp, wt_bytes, budget_bytes):
    """Hidden tile (multiple of 256) tiling H as tightly as possible within
    the per-step weight-block VMEM budget (double-buffered W1 + W2 blocks)."""
    best_th = 256
    best_pad = _round_up(H, 256) - H
    th = 512
    max_th = min(4096, _round_up(H, 256))
    while th <= max_th:
        if 4 * Dp * th * wt_bytes > budget_bytes:   # 2 bufs x (W1 blk + W2 blk)
            break
        pad = _round_up(H, th) - H
        if pad <= best_pad:                         # ties -> larger tile
            best_th, best_pad = th, pad
        th += 256
    return best_th


def _pad_cast_2d(a, rows, cols, dtype):
    """Zero-pad to (rows, cols) and cast; no-op when already aligned + typed
    (avoids extra HBM copy passes for the common aligned case)."""
    r, c = a.shape
    if (r, c) == (rows, cols):
        return a if a.dtype == dtype else a.astype(dtype)
    return jnp.zeros((rows, cols), dtype).at[:r, :c].set(a.astype(dtype))


# --------------------------------- kernels ----------------------------------

def _ffn_resident_kernel(x_ref, w1_ref, b1_ref, w2_ref, b2_ref, o_ref):
    # Whole hidden dim resident in VMEM: both matmuls in one grid step.
    x = x_ref[...].astype(w1_ref.dtype)          # in-kernel cast, hides under MXU
    h = jnp.dot(x, w1_ref[...], preferred_element_type=jnp.float32)
    h = jnp.maximum(h + b1_ref[...], 0.0)
    # TODO(synk): dropout is identity (eval-mode semantics); training-mode
    #             stochastic dropout would need pltpu.prng_seed/prng_random_bits.
    y = jnp.dot(h.astype(w2_ref.dtype), w2_ref[...],
                preferred_element_type=jnp.float32)
    o_ref[...] = (y + b2_ref[...]).astype(o_ref.dtype)


def _ffn_tiled_kernel(x_ref, w1_ref, b1_ref, w2_ref, b2_ref, o_ref, acc_ref):
    # Fallback for very large H: hidden dim tiled on a reduction ("arbitrary")
    # grid axis with an f32 accumulator in VMEM scratch.
    k = pl.program_id(1)

    @pl.when(k == 0)
    def _init():
        acc_ref[...] = jnp.zeros_like(acc_ref)

    x = x_ref[...].astype(w1_ref.dtype)
    h = jnp.dot(x, w1_ref[...], preferred_element_type=jnp.float32)
    h = jnp.maximum(h + b1_ref[...], 0.0)
    acc_ref[...] += jnp.dot(h.astype(w2_ref.dtype), w2_ref[...],
                            preferred_element_type=jnp.float32)

    @pl.when(k == pl.num_programs(1) - 1)
    def _finalize():
        o_ref[...] = (acc_ref[...] + b2_ref[...]).astype(o_ref.dtype)


# --------------------------------- wrapper ----------------------------------

@functools.partial(jax.jit, static_argnames=("compute_dtype", "force_path"))
def positionwise_feed_forward(x, w1, b1, w2, b2, *,
                              compute_dtype=jnp.bfloat16, force_path=None):
    """x: (..., input_dim) -> (..., input_dim).

    Weights are stored transposed relative to torch.nn.Linear:
      w1: (input_dim, inner_dim), w2: (inner_dim, input_dim).
    """
    orig_shape = x.shape
    D = orig_shape[-1]
    H = w1.shape[1]
    x2d = x.reshape(-1, D)
    M = x2d.shape[0]

    x_bytes = jnp.dtype(x.dtype).itemsize
    out_bytes = x_bytes
    wt_bytes = jnp.dtype(compute_dtype).itemsize

    vmem_limit = _vmem_budget_bytes()
    Dp = _round_up(D, 128)
    Hp_full = _round_up(H, 128)

    # Resident-weights fast path: double-buffered bf16 W1+W2 must fit ~1/3 of
    # the VMEM budget (leaving room for x / h / out blocks).
    resident_w_bytes = 2 * 2 * Dp * Hp_full * wt_bytes
    if force_path is None:
        resident = resident_w_bytes <= vmem_limit // 3
    else:
        resident = (force_path == "resident")

    if resident:
        Hp = Hp_full
        per_row = (2 * Dp * x_bytes            # double-buffered x block
                   + 2 * Dp * out_bytes        # double-buffered out block
                   + Hp * 4 + Dp * 4)          # f32 h / y temporaries
        budget = vmem_limit - resident_w_bytes - (2 << 20)
        tm = _select_row_tile(M, per_row, budget)
        Mp = _round_up(M, tm)

        xp = _pad_cast_2d(x2d, Mp, Dp, x2d.dtype)
        w1p = _pad_cast_2d(w1, Dp, Hp, compute_dtype)
        b1p = _pad_cast_2d(b1.reshape(1, H), 1, Hp, jnp.float32)
        w2p = _pad_cast_2d(w2, Hp, Dp, compute_dtype)
        b2p = _pad_cast_2d(b2.reshape(1, D), 1, Dp, jnp.float32)

        cost = pl.CostEstimate(
            flops=4 * Mp * Dp * Hp,
            transcendentals=0,
            bytes_accessed=(Mp * Dp * (x_bytes + out_bytes)
                            + 2 * Dp * Hp * wt_bytes + 4 * (Hp + Dp)),
        )

        out = pl.pallas_call(
            _ffn_resident_kernel,
            out_shape=jax.ShapeDtypeStruct((Mp, Dp), x.dtype),
            grid_spec=pltpu.PrefetchScalarGridSpec(
                num_scalar_prefetch=0,
                grid=(Mp // tm,),
                in_specs=[
                    pl.BlockSpec((tm, Dp), lambda i: (i, 0)),   # x rows
                    pl.BlockSpec((Dp, Hp), lambda i: (0, 0)),   # W1 (resident)
                    pl.BlockSpec((1, Hp), lambda i: (0, 0)),    # b1
                    pl.BlockSpec((Hp, Dp), lambda i: (0, 0)),   # W2 (resident)
                    pl.BlockSpec((1, Dp), lambda i: (0, 0)),    # b2
                ],
                out_specs=pl.BlockSpec((tm, Dp), lambda i: (i, 0)),
            ),
            compiler_params=pltpu.CompilerParams(
                dimension_semantics=("parallel",),
                vmem_limit_bytes=vmem_limit,
            ),
            cost_estimate=cost,
        )(xp, w1p, b1p, w2p, b2p)

    else:
        # Hidden dim too large to keep resident: tile H on a reduction axis.
        th = _select_hidden_tile(H, Dp, wt_bytes, vmem_limit // 2)
        Hp = _round_up(H, th)
        w_blk_bytes = 2 * 2 * Dp * th * wt_bytes   # 2 bufs x (W1 blk + W2 blk)
        per_row = (2 * Dp * x_bytes + 2 * Dp * out_bytes
                   + Dp * 4                        # f32 accumulator scratch
                   + th * 4)                       # f32 h temporary
        budget = vmem_limit - w_blk_bytes - (2 << 20)
        tm = _select_row_tile(M, per_row, budget)
        Mp = _round_up(M, tm)

        xp = _pad_cast_2d(x2d, Mp, Dp, x2d.dtype)
        w1p = _pad_cast_2d(w1, Dp, Hp, compute_dtype)
        b1p = _pad_cast_2d(b1.reshape(1, H), 1, Hp, jnp.float32)
        w2p = _pad_cast_2d(w2, Hp, Dp, compute_dtype)
        b2p = _pad_cast_2d(b2.reshape(1, D), 1, Dp, jnp.float32)

        cost = pl.CostEstimate(
            flops=4 * Mp * Dp * Hp,
            transcendentals=0,
            bytes_accessed=(Mp * Dp * (x_bytes + out_bytes)
                            + (Mp // tm) * 2 * Dp * Hp * wt_bytes),
        )

        # NOTE: if profiling shows an exposed DMA bubble at k-step boundaries,
        # pipeline_mode=pl.Buffered(3) on the W1/W2 specs deepens buffering.
        out = pl.pallas_call(
            _ffn_tiled_kernel,
            out_shape=jax.ShapeDtypeStruct((Mp, Dp), x.dtype),
            grid_spec=pltpu.PrefetchScalarGridSpec(
                num_scalar_prefetch=0,
                grid=(Mp // tm, Hp // th),          # reduction (H) axis last
                in_specs=[
                    pl.BlockSpec((tm, Dp), lambda i, k: (i, 0)),   # x rows
                    pl.BlockSpec((Dp, th), lambda i, k: (0, k)),   # W1[:, k]
                    pl.BlockSpec((1, th), lambda i, k: (0, k)),    # b1[k]
                    pl.BlockSpec((th, Dp), lambda i, k: (k, 0)),   # W2[k, :]
                    pl.BlockSpec((1, Dp), lambda i, k: (0, 0)),    # b2
                ],
                out_specs=pl.BlockSpec((tm, Dp), lambda i, k: (i, 0)),
                scratch_shapes=[pltpu.VMEM((tm, Dp), jnp.float32)],
            ),
            compiler_params=pltpu.CompilerParams(
                dimension_semantics=("parallel", "arbitrary"),
                vmem_limit_bytes=vmem_limit,
            ),
            cost_estimate=cost,
        )(xp, w1p, b1p, w2p, b2p)

    return out[:M, :D].reshape(orig_shape)


# ------------------------------ test harness --------------------------------

def xavier_normal(key, fan_out, fan_in, dtype=jnp.float32):
    # matches torch.nn.init.xavier_normal_ for a (fan_out, fan_in) weight
    std = (2.0 / (fan_in + fan_out)) ** 0.5
    return std * jax.random.normal(key, (fan_out, fan_in), dtype=dtype)


def _reference(x, w1, b1, w2, b2, compute_dtype=jnp.bfloat16):
    # Same bf16-operand / f32-accumulate recipe as the kernel.
    D = x.shape[-1]
    x2d = x.reshape(-1, D)
    h = jnp.maximum(
        jnp.dot(x2d.astype(compute_dtype), w1.astype(compute_dtype),
                preferred_element_type=jnp.float32) + b1.astype(jnp.float32),
        0.0)
    y = jnp.dot(h.astype(compute_dtype), w2.astype(compute_dtype),
                preferred_element_type=jnp.float32) + b2.astype(jnp.float32)
    return y.reshape(x.shape).astype(x.dtype)


if __name__ == "__main__":
    key = jax.random.PRNGKey(0)
    k_x, k_w1, k_w2, k_misc = jax.random.split(key, 4)

    # --- aligned shapes: no pad copies, resident-weights fast path ----------
    batch, seq = 2, 8
    input_dim, inner_dim = 128, 256

    # PyTorch-convention weights: Linear weight is (out_features, in_features)
    w1_t = xavier_normal(k_w1, inner_dim, input_dim)   # mlp_1.weight
    b1 = jnp.zeros((inner_dim,), jnp.float32)          # mlp_1.bias
    w2_t = xavier_normal(k_w2, input_dim, inner_dim)   # mlp_2.weight
    b2 = jnp.zeros((input_dim,), jnp.float32)          # mlp_2.bias
    w1, w2 = w1_t.T, w2_t.T                            # kernel layout: (in, out)

    x = jax.random.normal(k_x, (batch, seq, input_dim), jnp.float32)

    y = jax.block_until_ready(positionwise_feed_forward(x, w1, b1, w2, b2))
    assert y.shape == x.shape

    y_ref = _reference(x, w1, b1, w2, b2)
    assert jnp.allclose(y, y_ref, atol=1e-2, rtol=1e-2), \
        float(jnp.max(jnp.abs(y - y_ref)))

    # Loose sanity check against the pure-f32 reference as well.
    y_f32 = (jnp.maximum(x.reshape(-1, input_dim) @ w1 + b1, 0.0) @ w2
             + b2).reshape(x.shape)
    assert jnp.allclose(y, y_f32, atol=5e-2, rtol=5e-2)

    # --- tiled (H-reduction) fallback path on the same inputs ---------------
    y_tiled = jax.block_until_ready(
        positionwise_feed_forward(x, w1, b1, w2, b2, force_path="tiled"))
    assert jnp.allclose(y_tiled, y_ref, atol=1e-2, rtol=1e-2)

    # --- unaligned shapes: exercises the zero-padding path ------------------
    d2, h2 = 96, 200
    k_a, k_b, k_c = jax.random.split(k_misc, 3)
    w1b = xavier_normal(k_a, h2, d2).T                 # (d2, h2)
    w2b = xavier_normal(k_b, d2, h2).T                 # (h2, d2)
    b1b = jnp.zeros((h2,), jnp.float32)
    b2b = jnp.zeros((d2,), jnp.float32)
    xb = jax.random.normal(k_c, (3, 5, d2), jnp.float32)

    yb = jax.block_until_ready(
        positionwise_feed_forward(xb, w1b, b1b, w2b, b2b))
    yb_ref = _reference(xb, w1b, b1b, w2b, b2b)
    assert yb.shape == xb.shape
    assert jnp.allclose(yb, yb_ref, atol=1e-2, rtol=1e-2), \
        float(jnp.max(jnp.abs(yb - yb_ref)))

    print("KERNEL_OK")
</pallas_src>

<mosaic_0001>
module attributes {stable_mosaic.version = 11 : i64} {
  func.func @_ffn_resident_kernel(%arg0: i32, %arg1: memref<8x128xf32, #tpu.memory_space<vmem>>, %arg2: memref<128x256xbf16, #tpu.memory_space<vmem>>, %arg3: memref<1x256xf32, #tpu.memory_space<vmem>>, %arg4: memref<256x128xbf16, #tpu.memory_space<vmem>>, %arg5: memref<1x128xf32, #tpu.memory_space<vmem>>, %arg6: memref<8x128xf32, #tpu.memory_space<vmem>>) attributes {dimension_semantics = [#tpu.dimension_semantics<parallel>], iteration_bounds = array<i64: 2>, scalar_prefetch = 0 : i64, scratch_operands = 0 : i64, tpu.core_type = #tpu.core_type<tc>, window_params = [{transform_indices = @transform_0, window_bounds = array<i64: 8, 128>}, {pipeline_mode = #tpu.pipeline_mode<synchronous>, transform_indices = @transform_1, window_bounds = array<i64: 128, 256>}, {pipeline_mode = #tpu.pipeline_mode<synchronous>, transform_indices = @transform_2, window_bounds = array<i64: 1, 256>}, {pipeline_mode = #tpu.pipeline_mode<synchronous>, transform_indices = @transform_3, window_bounds = array<i64: 256, 128>}, {pipeline_mode = #tpu.pipeline_mode<synchronous>, transform_indices = @transform_4, window_bounds = array<i64: 1, 128>}, {transform_indices = @transform_5, window_bounds = array<i64: 8, 128>}]} {
    %c0 = arith.constant 0 : index
    %c0_0 = arith.constant 0 : index
    %0 = vector.load %arg1[%c0, %c0_0] : memref<8x128xf32, #tpu.memory_space<vmem>>, vector<8x128xf32>
    %1 = arith.truncf %0 : vector<8x128xf32> to vector<8x128xbf16>
    %c0_1 = arith.constant 0 : index
    %c0_2 = arith.constant 0 : index
    %2 = vector.load %arg2[%c0_1, %c0_2] : memref<128x256xbf16, #tpu.memory_space<vmem>>, vector<128x256xbf16>
    %cst = arith.constant dense<0.000000e+00> : vector<8x256xf32>
    %3 = tpu.matmul %1, %2, %cst {dimension_numbers = #tpu.dot_dimension_numbers<[1], [0], [0], [1], [0, 0, 1, 1], [], []>} : vector<8x128xbf16>, vector<128x256xbf16>, vector<8x256xf32> -> vector<8x256xf32>
    %c0_3 = arith.constant 0 : index
    %c0_4 = arith.constant 0 : index
    %4 = vector.load %arg3[%c0_3, %c0_4] : memref<1x256xf32, #tpu.memory_space<vmem>>, vector<1x256xf32>
    %5 = vector.broadcast %4 : vector<1x256xf32> to vector<8x256xf32>
    %6 = arith.addf %3, %5 : vector<8x256xf32>
    %cst_5 = arith.constant 0.000000e+00 : f32
    %7 = vector.broadcast %cst_5 : f32 to vector<8x256xf32>
    %8 = arith.maximumf %6, %7 : vector<8x256xf32>
    %9 = arith.truncf %8 : vector<8x256xf32> to vector<8x256xbf16>
    %c0_6 = arith.constant 0 : index
    %c0_7 = arith.constant 0 : index
    %10 = vector.load %arg4[%c0_6, %c0_7] : memref<256x128xbf16, #tpu.memory_space<vmem>>, vector<256x128xbf16>
    %cst_8 = arith.constant dense<0.000000e+00> : vector<8x128xf32>
    %11 = tpu.matmul %9, %10, %cst_8 {dimension_numbers = #tpu.dot_dimension_numbers<[1], [0], [0], [1], [0, 0, 1, 1], [], []>} : vector<8x256xbf16>, vector<256x128xbf16>, vector<8x128xf32> -> vector<8x128xf32>
    %c0_9 = arith.constant 0 : index
    %c0_10 = arith.constant 0 : index
    %12 = vector.load %arg5[%c0_9, %c0_10] : memref<1x128xf32, #tpu.memory_space<vmem>>, vector<1x128xf32>
    %13 = vector.broadcast %12 : vector<1x128xf32> to vector<8x128xf32>
    %14 = arith.addf %11, %13 : vector<8x128xf32>
    %c0_11 = arith.constant 0 : index
    %c0_12 = arith.constant 0 : index
    %15 = vector.load %arg6[%c0_11, %c0_12] : memref<8x128xf32, #tpu.memory_space<vmem>>, vector<8x128xf32>
    tpu.vector_store %arg6[%c0_11, %c0_12], %14 {strides = array<i32>} : memref<8x128xf32, #tpu.memory_space<vmem>>, vector<8x128xf32>,
    return
  }
  func.func @transform_0(%arg0: i32) -> (i32, i32) {
    %c0_i32 = arith.constant 0 : i32
    %c0_i32_0 = arith.constant 0 : i32
    return %arg0, %c0_i32 : i32, i32
  }
  func.func @transform_1(%arg0: i32) -> (i32, i32) {
    %c0_i32 = arith.constant 0 : i32
    %c0_i32_0 = arith.constant 0 : i32
    %c0_i32_1 = arith.constant 0 : i32
    return %c0_i32, %c0_i32_0 : i32, i32
  }
  func.func @transform_2(%arg0: i32) -> (i32, i32) {
    %c0_i32 = arith.constant 0 : i32
    %c0_i32_0 = arith.constant 0 : i32
    %c0_i32_1 = arith.constant 0 : i32
    return %c0_i32, %c0_i32_0 : i32, i32
  }
  func.func @transform_3(%arg0: i32) -> (i32, i32) {
    %c0_i32 = arith.constant 0 : i32
    %c0_i32_0 = arith.constant 0 : i32
    %c0_i32_1 = arith.constant 0 : i32
    return %c0_i32, %c0_i32_0 : i32, i32
  }
  func.func @transform_4(%arg0: i32) -> (i32, i32) {
    %c0_i32 = arith.constant 0 : i32
    %c0_i32_0 = arith.constant 0 : i32
    %c0_i32_1 = arith.constant 0 : i32
    return %c0_i32, %c0_i32_0 : i32, i32
  }
  func.func @transform_5(%arg0: i32) -> (i32, i32) {
    %c0_i32 = arith.constant 0 : i32
    %c0_i32_0 = arith.constant 0 : i32
    return %arg0, %c0_i32 : i32, i32
  }
}

</mosaic_0001>

<bundles_post_ra>
// kernel: positionwise_feed_forward.1
= control target key start
LH: loop header
LB: loop body
LE: loop exit
PB: predicated region body
PF: predicated region fallthrough
CT: control target
= control target key end

     0   :  { %10 = vsyncpa [#allocation3], 0  ;;  %s1068_s0 = inlined_call_operand.vmem [shape: f32[16,128], index: 0, kind: input, shape index: {}]   ;;  %s1069_s1 = inlined_call_operand.vmem [shape: bf16[128,256], index: 1, kind: input, shape index: {}]   ;;  %s1070_s2 = inlined_call_operand.vmem [shape: f32[1,256], index: 2, kind: input, shape index: {}]   ;;  %s1071_s3 = inlined_call_operand.vmem [shape: bf16[256,128], index: 3, kind: input, shape index: {}]   ;;  %s1072_s4 = inlined_call_operand.vmem [shape: f32[1,128], index: 4, kind: input, shape index: {}]   ;;  %s1073_s5 = inlined_call_operand.hbm [shape: f32[16,128], index: 5, kind: output, shape index: {}]  }
   0x1   :  { %12 = vsyncpa [#allocation3 + $0x1], 0  ;;  %s866_s18 = smov 0   ;;  %s868_s19 = smov 0  }
   0x2   :  { %s870_s20 = smov 0   ;;  %s872_s21 = smov 0  }
   0x3 LB: > { %s887_s22 = sadd.s32 4294967295, %s832_s21   ;;  %s625_s23 = sadd.s32 4294967294, %s832_s21   ;;  %s832_s21 = sphi %s872_s21, %s1079_s21   ;;  %s828_s20 = sphi %s870_s20, %s1078_s20   ;;  %s824_s19 = sphi %s868_s19, %s1077_s19   ;;  %s820_s18 = sphi %s866_s18, %s1076_s18  }
   0x4   : > { %s891_s24 = sadd.s32 1, %s832_s21   ;;  %s135_s25 = sadd.s32 1, %s828_s20 }
   0x5   : > { %s132_s26 = ssub.s32 %s832_s21, %s891_s24  ;;  %p145_p0 = scmp.ne.s32.totalorder %s828_s20, %s824_s19 }
   0x6   : > { %p133_p1 = scmp.eq.s32.totalorder %s132_s26, 0  ;;  %p146_p2 = scmp.eq.s32.totalorder %s887_s22, 1 }
   0x7   : > { %p151_p3 = scmp.ne.s32.totalorder %s824_s19, %s820_s18  ;;  %p152_p4 = scmp.eq.s32.totalorder %s625_s23, 1 }
   0x8   : > { %s902_s27 = scalar_select %p133_p1, %s828_s20, %s135_s25  }
   0x9   : > { %p904_p5 = por %p146_p2, %p145_p0  ;;  %p908_p6 = por %p152_p4, %p151_p3 }
   0xa   : > { %p628_p7 = scmp.ge.s32.totalorder %s832_s21, 1  ;;  %p189_p8 = scmp.lt.s32.totalorder %s832_s21, 3 }
   0xc   : > { %p190_p9 = pnand %p628_p7, %p189_p8 }
   0xd   : > { %v730_v0 = vld [vmem:[%s1069_s1 + $0x4] ss:$8 sps:$4 sm:$0xff] (!%p190_p9)   ;;  %v732_v1 = vld [vmem:[%s1069_s1] ss:$8 sps:$4 sm:$0xff] (!%p190_p9)   ;;  %v834_v2 = vmov (!%p190_p9), 0   ;;  %p216_p10 = scmp.lt.s32.totalorder (!%p190_p9), %s887_s22, 1  ;;  %v241_v35 = vlaneseq (!%p190_p9) }
   0xe   : > { %193 = sbr.rel (%p190_p9) target bundleno = 497 (0x1f1), region = 40  ;;  %363 = vmatprep.mubr.bf16.mxu0 (!%p190_p9), %v834_v2  ;;  %331 = vmatprep.subr.bf16.mxu0 (!%p190_p9), %v730_v0  ;;  %v733_v3 = vld [vmem:[%s1069_s1 + $0x14] ss:$8 sps:$4 sm:$0xff] (!%p190_p9)   ;;  %v735_v4 = vld [vmem:[%s1069_s1 + $0x10] ss:$8 sps:$4 sm:$0xff] (!%p190_p9)   ;;  %v754_v10 = vld [vmem:[%s1071_s3 + $0x40] sm:$0xff] (!%p190_p9)  }
   0xf   : > { %332 = vmatpush1.bf16.msra.mxu0 (!%p190_p9), %v732_v1  ;;  %v736_v5 = vld [vmem:[%s1069_s1 + $0x24] ss:$8 sps:$4 sm:$0xff] (!%p190_p9)   ;;  %v738_v6 = vld [vmem:[%s1069_s1 + $0x20] ss:$8 sps:$4 sm:$0xff] (!%p190_p9)   ;;  %v739_v7 = vld [vmem:[%s1069_s1 + $0x34] ss:$8 sps:$4 sm:$0xff] (!%p190_p9)   ;;  %668 = vmatprep.subr.bf16.mxu1 (!%p190_p9), %v754_v10 }
  0x10   : > { %333 = vmatprep.subr.bf16.mxu0 (!%p190_p9), %v733_v3  ;;  %v741_v8 = vld [vmem:[%s1069_s1 + $0x30] ss:$8 sps:$4 sm:$0xff] (!%p190_p9)   ;;  %v742_v9 = vld [vmem:[%s1069_s1 + $0x44] ss:$8 sps:$4 sm:$0xff] (!%p190_p9)   ;;  %v744_v12 = vld [vmem:[%s1069_s1 + $0x40] ss:$8 sps:$4 sm:$0xff] (!%p190_p9)  }
  0x11   : > { %v755_v11 = vld [vmem:[%s1071_s3] sm:$0xff] (!%p190_p9)   ;;  %v756_v13 = vld [vmem:[%s1071_s3 + $0x48] sm:$0xff] (!%p190_p9)   ;;  %v758_v15 = vld [vmem:[%s1071_s3 + $0x50] sm:$0xff] (!%p190_p9)   ;;  %v242_v36 = vshrl.u32 (!%p190_p9), %v241_v35, 7  ;;  %s213_s13 = sand.u32 (!%p190_p9), 1, %s824_s19  }
  0x12   : > { %669 = vmatpush3.bf16.msra.mxu1 (!%p190_p9), %v755_v11  ;;  %v757_v14 = vld [vmem:[%s1071_s3 + $0x8] sm:$0xff] (!%p190_p9)   ;;  %v745_v16 = vld [vmem:[%s1069_s1 + $0x54] ss:$8 sps:$4 sm:$0xff] (!%p190_p9)   ;;  %v747_v17 = vld [vmem:[%s1069_s1 + $0x50] ss:$8 sps:$4 sm:$0xff] (!%p190_p9)   ;;  %s629_s14 = sshll.u32 (!%p190_p9), %s213_s13, 3 }
  0x13   : > { %334 = vmatpush1.bf16.msra.mxu0 (!%p190_p9), %v735_v4  ;;  %670 = vmatprep.subr.bf16.mxu1 (!%p190_p9), %v756_v13  ;;  %v759_v18 = vld [vmem:[%s1071_s3 + $0x10] sm:$0xff] (!%p190_p9)   ;;  %v760_v19 = vld [vmem:[%s1071_s3 + $0x58] sm:$0xff] (!%p190_p9)   ;;  %v748_v20 = vld [vmem:[%s1069_s1 + $0x64] ss:$8 sps:$4 sm:$0xff] (!%p190_p9)   ;;  %v243_v37 = vsub.s32 (!%p190_p9), 0, %v242_v36  ;;  %v247_v39 = vsub.s32 (!%p190_p9), 1, %v242_v36 }
  0x14   : > { %335 = vmatprep.subr.bf16.mxu0 (!%p190_p9), %v736_v5  ;;  %v750_v21 = vld [vmem:[%s1069_s1 + $0x60] ss:$8 sps:$4 sm:$0xff] (!%p190_p9)   ;;  %v751_v22 = vld [vmem:[%s1069_s1 + $0x74] ss:$8 sps:$4 sm:$0xff] (!%p190_p9)   ;;  %v753_v26 = vld [vmem:[%s1069_s1 + $0x70] ss:$8 sps:$4 sm:$0xff] (!%p190_p9)  }
  0x15   : > { %s217_s17 = scalar_select %p216_p10, %s887_s22, 1  ;;  %v761_v23 = vld [vmem:[%s1071_s3 + $0x18] sm:$0xff]   ;;  %v762_v24 = vld [vmem:[%s1071_s3 + $0x60] sm:$0xff]   ;;  %v764_v28 = vld [vmem:[%s1071_s3 + $0x68] sm:$0xff]  }
  0x16   : > { %671 = vmatpush3.bf16.msra.mxu1 %v757_v14  ;;  %v763_v25 = vld [vmem:[%s1071_s3 + $0x20] sm:$0xff]   ;;  %v765_v30 = vld [vmem:[%s1071_s3 + $0x28] sm:$0xff]   ;;  %v766_v31 = vld [vmem:[%s1071_s3 + $0x70] sm:$0xff]   ;;  %s215_s23 = scalar_lea.vmem [#allocation2], %s629_s14  ;;  %s553_s6 = scalar_lea.sflag [#allocation3], %s213_s13 }
  0x17   : > { %336 = vmatpush1.bf16.msra.mxu0 %v738_v6  ;;  %s630_s10 = sshll.u32 %s217_s17, 3  ;;  %672 = vmatprep.subr.bf16.mxu1 %v758_v15  ;;  %v767_v32 = vld [vmem:[%s1071_s3 + $0x30] sm:$0xff]   ;;  %v768_v33 = vld [vmem:[%s1071_s3 + $0x78] sm:$0xff]   ;;  %v239_v38 = vld [vmem:[%s1070_s2] sm:$0x3]  ;;  %s566_s25 = sshll.u32 %s215_s23, 4  ;;  %s1028_s25 = int_to_ptr.vmem [resolvable:$true] %s566_s25 }
  0x18   : > { %337 = vmatprep.subr.bf16.mxu0 %v739_v7  ;;  %s219_s9 = scalar_lea.vmem %s1068_s0, %s630_s10  ;;  %v769_v34 = vld [vmem:[%s1071_s3 + $0x38] sm:$0xff]   ;;  %v244_v40 = vrot.slane %v239_v38, %v243_v37  ;;  %v248_v41 = vrot.slane %v239_v38, %v247_v39  ;;  %v647_v53 = vld [vmem:[%s1072_s4] ss:$0 sm:$0xff]  ;;  %s665_s10 = sshll.u32 %s887_s22, 7 }
  0x19   : > { %v221_v27 = vld [vmem:[%s219_s9] sm:$0xff]  ;;  %s1026_s30 = scalar_lea.hbm %s1073_s5, %s665_s10  ;;  %s770_s7 = scalar_lea.vmem %s1028_s25, 128 }
  0x1a   : > { %673 = vmatpush3.bf16.msra.mxu1 %v759_v18  ;;  %v222_v29 = vpack.c.bf16 %v221_v27, %v221_v27  ;;  %p771_p11 = scmp.ne.s32.totalorder %s1028_s25, %s770_s7  ;;  %s835_s22 = smov [#allocation2]  }
  0x1b   : > { %338 = vmatpush1.bf16.msra.mxu0 %v741_v8  ;;  %674 = vmatprep.subr.bf16.mxu1 %v760_v19  ;;  %s774_s8 = sshll.u32 %s835_s22, 4  ;;  %s775_s8 = int_to_ptr.vmem [resolvable:$false] %s774_s8 }
  0x1c   : > { %339 = vmatprep.subr.bf16.mxu0 %v742_v9  ;;  %p772_p12 = pnand %p771_p11, %p904_p5  ;;  %s776_s9 = scalar_lea.vmem %s775_s8, 256 }
  0x1d   : > { %p777_p0 = scmp.lt.s32.totalorder %s1028_s25, %s775_s8  ;;  %p778_p1 = scmp.lt.s32.totalorder %s776_s9, %s770_s7 }
  0x1e   : > { %675 = vmatpush3.bf16.msra.mxu1 %v761_v23  ;;  %p773_p13 = pneg %p772_p12 }
  0x1f   : > { %340 = vmatpush1.bf16.msra.mxu0 %v744_v12  ;;  %676 = vmatprep.subr.bf16.mxu1 %v762_v24  ;;  %p779_p2 = por %p778_p1, %p777_p0 }
  0x20   : > { %341 = vmatprep.subr.bf16.mxu0 %v745_v16 }
  0x21   : > { %p780_p3 = pnand %p779_p2, %p773_p13 }
  0x22   : > { %677 = vmatpush3.bf16.msra.mxu1 %v763_v25 }
  0x23   : > { %342 = vmatpush1.bf16.msra.mxu0 %v747_v17  ;;  %678 = vmatprep.subr.bf16.mxu1 %v764_v28 }
  0x24   : > { %343 = vmatprep.subr.bf16.mxu0 %v748_v20 }
  0x26   : > { %679 = vmatpush3.bf16.msra.mxu1 %v765_v30 }
  0x27   : > { %344 = vmatpush1.bf16.msra.mxu0 %v750_v21  ;;  %680 = vmatprep.subr.bf16.mxu1 %v766_v31 }
  0x28   : > { %345 = vmatprep.subr.bf16.mxu0 %v751_v22 }
  0x2a   : > { %681 = vmatpush3.bf16.msra.mxu1 %v767_v32 }
  0x2b   : > { %346 = vmatpush1.bf16.msra.mxu0 %v753_v26  ;;  %682 = vmatprep.subr.bf16.mxu1 %v768_v33 }
  0x2e   : > { %364 = vmatmul.mubr.bf16.vlgmr.msra.gmra.mrb[0].mxu0 %v222_v29  ;;  %683 = vmatpush3.bf16.msra.mxu1 %v769_v34 }
 0x101   : > { %v365_v42 = vpop.f32.mrb[0].mxu0 }
 0x102   : > { %v366_v43 = vadd.f32 %v365_v42, %v244_v40  ;;  %v367_v44 = vpop.f32.mrb[1].mxu0 }
 0x103   : > { %v368_v45 = vadd.f32 %v367_v44, %v248_v41  ;;  %v369_v46 = vpop.f32.mrb[2].mxu0 }
 0x104   : > { %v372_v47 = vmax.f32 %v366_v43, 0.0  ;;  %v370_v48 = vpop.f32.mrb[3].mxu0 }
 0x105   : > { %v373_v49 = vmax.f32 %v368_v45, 0.0 }
 0x106   : > { %v374_v51 = vpack.c.bf16 %v372_v47, %v372_v47 }
 0x107   : > { %v375_v50 = vpack.c.bf16 %v373_v49, %v373_v49 }
 0x109   : > { %543 = vmatprep.mubr.bf16.mxu1 %v375_v50 }
 0x10a   : > { %544 = vmatmul.mubr.bf16.vlgmr.msra.gmra.mrb[0].mxu1 %v374_v51 }
 0x1dd   : > { %v684_v52 = vpop.f32.mrb[0].mxu1 }
 0x1de   : > { %v685_v54 = vpop.f32.mrb[1].mxu1 }
 0x1df   : > { %v686_v55 = vadd.f32 %v685_v54, %v684_v52  ;;  %v687_v56 = vpop.f32.mrb[2].mxu1 }
 0x1e0   : > { %v688_v57 = vpop.f32.mrb[3].mxu1 }
 0x1e1   : > { %v546_v58 = vadd.f32 %v686_v55, %v647_v53 }
 0x1e3   : > { %551 = vst [vmem:[%s215_s23] sm:$0xff] %v546_v58 }
 0x1e4   : > { %783 = shalt.err (!%p780_p3)
}
 0x1e5   : > { %s784_s11 = scalar_lea.hbm %s1026_s30, 128  ;;  %s788_s14 = scalar_lea.hbm %s1073_s5, 256 }
 0x1e6   : > { %p785_p4 = scmp.ne.s32.totalorder %s1026_s30, %s784_s11  ;;  %p789_p9 = scmp.lt.u32.totalorder %s1026_s30, %s1073_s5 }
 0x1e7   : > { %p790_p10 = scmp.lt.u32.totalorder %s788_s14, %s784_s11  ;;  %p792_p12 = scmp.lt.u32.totalorder %s784_s11, %s1026_s30 }
 0x1e8   : > { %p786_p7 = pnand %p785_p4, %p904_p5 }
 0x1e9   : > { %p791_p11 = por %p790_p10, %p789_p9 }
 0x1ea   : > { %p787_p8 = pneg %p786_p7 }
 0x1eb   : > { %p793_p13 = por %p792_p12, %p791_p11 }
 0x1ed   : > { %p794_p0 = pnand %p793_p13, %p787_p8 }
 0x1ef   : > { %797 = shalt.err (!%p794_p0)
}
 0x1f0   : > { %690 = dma.vmem_to_hbm [thread:$0]  (%p904_p5), %s1028_s25, 128, %s1026_s30, %s553_s6  }
 0x1f1 PF: > { %p696_p1 = scmp.ge.s32.totalorder %s832_s21, 2  ;;  %s578_s10 = sand.u32 1, %s820_s18  }
 0x1f2   : > { %s579_s23 = scalar_lea.sflag [#allocation3], %s578_s10 }
 0x1f3   : > { %p693_p2 = pnand %p696_p1, %p908_p6 }
 0x1f5   : > { %815 = dma.done.wait (!%p693_p2), %s579_s23, 128  }
 0x1f6   : > { %817 = vsyncadd (!%p693_p2), %s579_s23, 4294967168  ;;  %p15_p3 = scmp.ge.s32.totalorder %s891_s24, 4   ;;  %s1076_s18 = smov %s824_s19 }
 0x1f7   : > { %s1077_s19 = smov %s828_s20  ;;  %s1078_s20 = smov %s902_s27 }
 0x1f8   : > { %s1079_s21 = smov %s891_s24  ;;  %17 = sbr.rel (!%p15_p3) target bundleno = 3 (0x3), region = 75 }
 0x1ff   :  { %584 = vsyncpa [#allocation3], 1 }
 0x200   :  { %586 = vsyncpa [#allocation3 + $0x1], 1 }

</bundles_post_ra>
